<compile_context>
chip_gen: v5e
topology: v5e:2x2
jax: 0.10.0
libtpu: 0.0.40
codegen_flags: <defaults>
</compile_context>

<pallas_src>
import jax
import jax.numpy as jnp
from jax.experimental import pallas as pl
from jax.experimental.pallas import tpu as pltpu

INP_DIM = 64
HID_DIM = 13
NUM_CLASSES = 10
CLS_PAD = 128                  # classifier occupies lanes [0, 128); decoder [128, 192)
FUSED_N = CLS_PAD + INP_DIM    # 192
BATCH_TILE = 512               # big tiles amortize per-step overhead (~85% roofline)


def _mynn_kernel(x_ref, we_ref, be_ref, wcd_ref, bcd_ref, ypred_ref, xdec_ref):
    # Encoder + ReLU
    x = x_ref[...]                                                  # (TB, 64)
    h = jnp.dot(x, we_ref[...], preferred_element_type=jnp.float32)
    h = jnp.maximum(h + be_ref[...], 0.0)                           # (TB, 13)

    # Fused classifier+decoder matmul (shared K=13 LHS, one MXU pass).
    out = jnp.dot(h, wcd_ref[...], preferred_element_type=jnp.float32)
    out = out + bcd_ref[...]                                        # (TB, 192)

    # Classifier + softmax (numerically stable, dim=-1 == PyTorch dim=1).
    # Exact division so rows sum to 1 within fp32 rounding.
    logits = out[:, :NUM_CLASSES]                                   # lanes 0..9
    logits = logits - jnp.max(logits, axis=-1, keepdims=True)
    e = jnp.exp(logits)
    ypred_ref[...] = e / jnp.sum(e, axis=-1, keepdims=True)

    # Decoder output: lane-aligned slice starting at lane 128.
    xdec_ref[...] = out[:, CLS_PAD:]                                # (TB, 64)


def mynn_forward(x, params):
    """x: (B, ...) with prod(...) == INP_DIM. Returns (y_pred, x_dec)."""
    b = x.shape[0]
    x2d = x.reshape(b, INP_DIM).astype(jnp.float32)
    we, be, wc, bc, wd, bd = params

    # Pack classifier + decoder into one fused RHS / bias, decoder at lane 128.
    wcd = jnp.zeros((HID_DIM, FUSED_N), jnp.float32)
    wcd = wcd.at[:, :NUM_CLASSES].set(wc).at[:, CLS_PAD:].set(wd)
    bcd = jnp.zeros((1, FUSED_N), jnp.float32)
    bcd = bcd.at[:, :NUM_CLASSES].set(bc).at[:, CLS_PAD:].set(bd)

    # Batch tiling: big tile for DMA/compute overlap; small batches get one
    # sublane-aligned block.  Pad rows to a multiple of the tile (zero rows are
    # harmless for the row-wise math) and slice outputs back afterwards.
    tb = BATCH_TILE if b >= BATCH_TILE else max(8, -(-b // 8) * 8)
    bp = pl.cdiv(b, tb) * tb
    xp = x2d if bp == b else jnp.pad(x2d, ((0, bp - b), (0, 0)))
    grid = (bp // tb,)

    def row_spec(n):
        return pl.BlockSpec((tb, n), lambda i: (i, 0), memory_space=pltpu.VMEM)

    def resident_spec(a):  # whole array, stays in VMEM across grid steps
        return pl.BlockSpec(a.shape, lambda i: (0,) * a.ndim,
                            memory_space=pltpu.VMEM)

    y_pred, x_dec = pl.pallas_call(
        _mynn_kernel,
        out_shape=(
            jax.ShapeDtypeStruct((bp, NUM_CLASSES), jnp.float32),
            jax.ShapeDtypeStruct((bp, INP_DIM), jnp.float32),
        ),
        grid=grid,
        in_specs=[row_spec(INP_DIM),
                  resident_spec(we), resident_spec(be),
                  resident_spec(wcd), resident_spec(bcd)],
        out_specs=(row_spec(NUM_CLASSES), row_spec(INP_DIM)),
        compiler_params=pltpu.CompilerParams(
            dimension_semantics=("parallel",)),
    )(xp, we, be, wcd, bcd)

    return y_pred[:b], x_dec[:b]


def init_params(key):
    """Deterministic init matching nn.Linear shapes (stored transposed)."""
    ks = jax.random.split(key, 6)

    def lin(kw, kb, fan_in, fan_out):
        bound = 1.0 / jnp.sqrt(fan_in)
        w = jax.random.uniform(kw, (fan_in, fan_out), jnp.float32,
                               -bound, bound)
        b_ = jax.random.uniform(kb, (1, fan_out), jnp.float32, -bound, bound)
        return w, b_

    we, be = lin(ks[0], ks[1], INP_DIM, HID_DIM)       # fc_encoder
    wc, bc = lin(ks[2], ks[3], HID_DIM, NUM_CLASSES)   # fc_classifier
    wd, bd = lin(ks[4], ks[5], HID_DIM, INP_DIM)       # fc_decoder
    return we, be, wc, bc, wd, bd


def _reference(x2d, params):
    we, be, wc, bc, wd, bd = params
    h = jnp.maximum(x2d @ we + be, 0.0)
    return jax.nn.softmax(h @ wc + bc, axis=-1), h @ wd + bd


if __name__ == "__main__":
    key = jax.random.PRNGKey(0)
    kx, kx2, kp = jax.random.split(key, 3)
    params = init_params(kp)
    fwd = jax.jit(mynn_forward)

    # --- small MNIST-like input: batch=2, flattened to (2, 64) in the wrapper
    x = jax.random.normal(kx, (2, 8, 8), dtype=jnp.float32)
    y_pred, x_dec = fwd(x, params)
    jax.block_until_ready((y_pred, x_dec))

    y_ref, xd_ref = _reference(x.reshape(2, INP_DIM), params)
    assert y_pred.shape == (2, NUM_CLASSES) and x_dec.shape == (2, INP_DIM)
    assert jnp.allclose(y_pred, y_ref, atol=1e-4)
    assert jnp.allclose(x_dec, xd_ref, atol=1e-4)
    assert jnp.allclose(jnp.sum(y_pred, axis=-1), 1.0, atol=1e-4)

    # --- ragged larger batch: exercises the tiled grid + padding path
    xb = jax.random.normal(kx2, (1037, 8, 8), dtype=jnp.float32)
    yb, xdb = fwd(xb, params)
    jax.block_until_ready((yb, xdb))
    yb_ref, xdb_ref = _reference(xb.reshape(1037, INP_DIM), params)
    assert yb.shape == (1037, NUM_CLASSES) and xdb.shape == (1037, INP_DIM)
    assert jnp.allclose(yb, yb_ref, atol=1e-4)
    assert jnp.allclose(xdb, xdb_ref, atol=1e-4)
    assert jnp.allclose(jnp.sum(yb, axis=-1), 1.0, atol=1e-4)

    print("KERNEL_OK")
</pallas_src>

<mosaic_0001>
module attributes {stable_mosaic.version = 11 : i64} {
  func.func @_mynn_kernel(%arg0: i32, %arg1: memref<8x64xf32, #tpu.memory_space<vmem>>, %arg2: memref<64x13xf32, #tpu.memory_space<vmem>>, %arg3: memref<1x13xf32, #tpu.memory_space<vmem>>, %arg4: memref<13x192xf32, #tpu.memory_space<vmem>>, %arg5: memref<1x192xf32, #tpu.memory_space<vmem>>, %arg6: memref<8x10xf32, #tpu.memory_space<vmem>>, %arg7: memref<8x64xf32, #tpu.memory_space<vmem>>) attributes {dimension_semantics = [#tpu.dimension_semantics<parallel>], iteration_bounds = array<i64: 1>, scalar_prefetch = 0 : i64, scratch_operands = 0 : i64, tpu.core_type = #tpu.core_type<tc>, window_params = [{transform_indices = @transform_0, window_bounds = array<i64: 8, 64>}, {pipeline_mode = #tpu.pipeline_mode<synchronous>, transform_indices = @transform_1, window_bounds = array<i64: 64, 13>}, {pipeline_mode = #tpu.pipeline_mode<synchronous>, transform_indices = @transform_2, window_bounds = array<i64: 1, 13>}, {pipeline_mode = #tpu.pipeline_mode<synchronous>, transform_indices = @transform_3, window_bounds = array<i64: 13, 192>}, {pipeline_mode = #tpu.pipeline_mode<synchronous>, transform_indices = @transform_4, window_bounds = array<i64: 1, 192>}, {transform_indices = @transform_5, window_bounds = array<i64: 8, 10>}, {transform_indices = @transform_6, window_bounds = array<i64: 8, 64>}]} {
    %c0 = arith.constant 0 : index
    %c0_0 = arith.constant 0 : index
    %0 = vector.load %arg1[%c0, %c0_0] : memref<8x64xf32, #tpu.memory_space<vmem>>, vector<8x64xf32>
    %c0_1 = arith.constant 0 : index
    %c0_2 = arith.constant 0 : index
    %1 = vector.load %arg2[%c0_1, %c0_2] : memref<64x13xf32, #tpu.memory_space<vmem>>, vector<64x13xf32>
    %cst = arith.constant dense<0.000000e+00> : vector<8x13xf32>
    %2 = tpu.matmul %0, %1, %cst {dimension_numbers = #tpu.dot_dimension_numbers<[1], [0], [0], [1], [0, 0, 1, 1], [], []>} : vector<8x64xf32>, vector<64x13xf32>, vector<8x13xf32> -> vector<8x13xf32>
    %c0_3 = arith.constant 0 : index
    %c0_4 = arith.constant 0 : index
    %3 = vector.load %arg3[%c0_3, %c0_4] : memref<1x13xf32, #tpu.memory_space<vmem>>, vector<1x13xf32>
    %4 = vector.broadcast %3 : vector<1x13xf32> to vector<8x13xf32>
    %5 = arith.addf %2, %4 : vector<8x13xf32>
    %cst_5 = arith.constant 0.000000e+00 : f32
    %6 = vector.broadcast %cst_5 : f32 to vector<8x13xf32>
    %7 = arith.maximumf %5, %6 : vector<8x13xf32>
    %c0_6 = arith.constant 0 : index
    %c0_7 = arith.constant 0 : index
    %8 = vector.load %arg4[%c0_6, %c0_7] : memref<13x192xf32, #tpu.memory_space<vmem>>, vector<13x192xf32>
    %cst_8 = arith.constant dense<0.000000e+00> : vector<8x192xf32>
    %9 = tpu.matmul %7, %8, %cst_8 {dimension_numbers = #tpu.dot_dimension_numbers<[1], [0], [0], [1], [0, 0, 1, 1], [], []>} : vector<8x13xf32>, vector<13x192xf32>, vector<8x192xf32> -> vector<8x192xf32>
    %c0_9 = arith.constant 0 : index
    %c0_10 = arith.constant 0 : index
    %10 = vector.load %arg5[%c0_9, %c0_10] : memref<1x192xf32, #tpu.memory_space<vmem>>, vector<1x192xf32>
    %11 = vector.broadcast %10 : vector<1x192xf32> to vector<8x192xf32>
    %12 = arith.addf %9, %11 : vector<8x192xf32>
    %13 = vector.extract_strided_slice %12 {offsets = [0, 0], sizes = [8, 10], strides = [1, 1]} : vector<8x192xf32> to vector<8x10xf32>
    %cst_11 = arith.constant dense<0xFF800000> : vector<8xf32>
    %14 = vector.multi_reduction <maximumf>, %13, %cst_11 [1] : vector<8x10xf32> to vector<8xf32>
    %15 = vector.shape_cast %14 : vector<8xf32> to vector<8x1xf32>
    %16 = vector.broadcast %15 : vector<8x1xf32> to vector<8x10xf32>
    %17 = arith.subf %13, %16 : vector<8x10xf32>
    %18 = math.exp %17 : vector<8x10xf32>
    %cst_12 = arith.constant dense<0.000000e+00> : vector<8xf32>
    %19 = vector.multi_reduction <add>, %18, %cst_12 [1] : vector<8x10xf32> to vector<8xf32>
    %20 = vector.shape_cast %19 : vector<8xf32> to vector<8x1xf32>
    %21 = vector.broadcast %20 : vector<8x1xf32> to vector<8x10xf32>
    %22 = arith.divf %18, %21 : vector<8x10xf32>
    %c0_13 = arith.constant 0 : index
    %c0_14 = arith.constant 0 : index
    %23 = vector.load %arg6[%c0_13, %c0_14] : memref<8x10xf32, #tpu.memory_space<vmem>>, vector<8x10xf32>
    tpu.vector_store %arg6[%c0_13, %c0_14], %22 {strides = array<i32>} : memref<8x10xf32, #tpu.memory_space<vmem>>, vector<8x10xf32>,
    %24 = vector.extract_strided_slice %12 {offsets = [0, 128], sizes = [8, 64], strides = [1, 1]} : vector<8x192xf32> to vector<8x64xf32>
    %c0_15 = arith.constant 0 : index
    %c0_16 = arith.constant 0 : index
    %25 = vector.load %arg7[%c0_15, %c0_16] : memref<8x64xf32, #tpu.memory_space<vmem>>, vector<8x64xf32>
    tpu.vector_store %arg7[%c0_15, %c0_16], %24 {strides = array<i32>} : memref<8x64xf32, #tpu.memory_space<vmem>>, vector<8x64xf32>,
    return
  }
  func.func @transform_0(%arg0: i32) -> (i32, i32) {
    %c0_i32 = arith.constant 0 : i32
    %c0_i32_0 = arith.constant 0 : i32
    return %arg0, %c0_i32 : i32, i32
  }
  func.func @transform_1(%arg0: i32) -> (i32, i32) {
    %c0_i32 = arith.constant 0 : i32
    %c0_i32_0 = arith.constant 0 : i32
    %c0_i32_1 = arith.constant 0 : i32
    return %c0_i32, %c0_i32_0 : i32, i32
  }
  func.func @transform_2(%arg0: i32) -> (i32, i32) {
    %c0_i32 = arith.constant 0 : i32
    %c0_i32_0 = arith.constant 0 : i32
    %c0_i32_1 = arith.constant 0 : i32
    return %c0_i32, %c0_i32_0 : i32, i32
  }
  func.func @transform_3(%arg0: i32) -> (i32, i32) {
    %c0_i32 = arith.constant 0 : i32
    %c0_i32_0 = arith.constant 0 : i32
    %c0_i32_1 = arith.constant 0 : i32
    return %c0_i32, %c0_i32_0 : i32, i32
  }
  func.func @transform_4(%arg0: i32) -> (i32, i32) {
    %c0_i32 = arith.constant 0 : i32
    %c0_i32_0 = arith.constant 0 : i32
    %c0_i32_1 = arith.constant 0 : i32
    return %c0_i32, %c0_i32_0 : i32, i32
  }
  func.func @transform_5(%arg0: i32) -> (i32, i32) {
    %c0_i32 = arith.constant 0 : i32
    %c0_i32_0 = arith.constant 0 : i32
    return %arg0, %c0_i32 : i32, i32
  }
  func.func @transform_6(%arg0: i32) -> (i32, i32) {
    %c0_i32 = arith.constant 0 : i32
    %c0_i32_0 = arith.constant 0 : i32
    return %arg0, %c0_i32 : i32, i32
  }
}

</mosaic_0001>

<bundles_post_ra>
// kernel: mynn_forward.1
= control target key start
LH: loop header
LB: loop body
LE: loop exit
PB: predicated region body
PF: predicated region fallthrough
CT: control target
= control target key end

     0   :  { %vm35_vm0 = vcmask 523264   ;;  %vm74_vm1 = vcmask 1044480   ;;  %vm70_vm2 = vcmask 105472   ;;  %vm121_vm3 = vcmask 80896   ;;  %s257_s1 = inlined_call_operand.vmem [shape: f32[64,13], index: 1, kind: input, shape index: {}]   ;;  %s258_s2 = inlined_call_operand.vmem [shape: f32[1,13], index: 2, kind: input, shape index: {}]   ;;  %s259_s0 = inlined_call_operand.vmem [shape: f32[8,64], index: 0, kind: input, shape index: {}]   ;;  %s260_s3 = inlined_call_operand.vmem [shape: f32[13,192], index: 3, kind: input, shape index: {}]   ;;  %s261_s4 = inlined_call_operand.vmem [shape: f32[1,192], index: 4, kind: input, shape index: {}]   ;;  %s262_s6 = inlined_call_operand.vmem [shape: f32[8,64], index: 6, kind: output, shape index: {1}]   ;;  %s263_s5 = inlined_call_operand.vmem [shape: f32[8,10], index: 5, kind: output, shape index: {0}]  }
   0x1   :  { %v30_v0 = vld [vmem:[%s257_s1 + $0x38] sm:$0xff]  ;;  %v29_v1 = vld [vmem:[%s257_s1 + $0x30] sm:$0xff]  ;;  %v28_v2 = vld [vmem:[%s257_s1 + $0x28] sm:$0xff] }
   0x2   :  { %47 = vmatpush.msra.mxu0 %v30_v0  ;;  %v27_v3 = vld [vmem:[%s257_s1 + $0x20] sm:$0xff]  ;;  %v26_v4 = vld [vmem:[%s257_s1 + $0x18] sm:$0xff]  ;;  %v25_v5 = vld [vmem:[%s257_s1 + $0x10] sm:$0xff] }
   0x3   :  { %v24_v6 = vld [vmem:[%s257_s1 + $0x8] sm:$0xff]  ;;  %v23_v7 = vld [vmem:[%s257_s1] sm:$0xff]  ;;  %v62_v9 = vld [vmem:[%s260_s3 + $0x10] sm:$0x1f] }
   0x4   :  { %48 = vmatpush.msra.mxu0 %v29_v1  ;;  %v22_v8 = vld [vmem:[%s259_s0] sm:$0xff]  ;;  %v63_v10 = vld [vmem:[%s260_s3 + $0x18] sm:$0x1f]  ;;  %157 = vmatpush.msk.msra.mxu1 %vm74_vm1, %v62_v9  ;;  %v61_v12 = vld [vmem:[%s260_s3 + $0x8] sm:$0xff] }
   0x5   :  { %159 = vmatpush.msk.msra.mxu2 %vm74_vm1, %v63_v10  ;;  %v60_v11 = vld [vmem:[%s260_s3] sm:$0xff] }
   0x6   :  { %49 = vmatpush.msra.mxu0 %v28_v2  ;;  %96 = vmatpush.msra.mxu1 %v60_v11  ;;  %v161_v13 = vld [vmem:[%s258_s2] ss:$0 sm:$0xff] }
   0x7   :  { %116 = vmatpush.msra.mxu2 %v61_v12  ;;  %v64_v17 = vld [vmem:[%s261_s4] sm:$0x3] }
   0x8   :  { %50 = vmatpush.msra.mxu0 %v27_v3  ;;  %v66_v18 = vperm.slane %v64_v17, 0  ;;  %v67_v22 = vperm.slane %v64_v17, 1 }
   0xa   :  { %51 = vmatpush.msra.mxu0 %v26_v4 }
   0xc   :  { %52 = vmatpush.msra.mxu0 %v25_v5 }
   0xe   :  { %53 = vmatpush.msra.mxu0 %v24_v6 }
  0x10   :  { %54 = vmatpush.msra.mxu0 %v23_v7 }
  0x11   :  { %156 = vmatmul.msk.f32.vlgmr.msra.gmra.mxu0 %vm35_vm0, %v22_v8 }
  0x8e   :  { %v56_v14 = vpop.f32.mrf.mxu0 }
  0x8f   :  { %v57_v15 = vadd.f32 %v161_v13, %v56_v14 }
  0x91   :  { %v59_v16 = vmax.f32 %v57_v15, 0.0 }
  0x93   :  { %158 = vmatmul.msk.f32.vlgmr.msra.gmra.mxu1 %vm70_vm2, %v59_v16  ;;  %160 = vmatmul.msk.f32.vlgmr.msra.gmra.mxu2 %vm70_vm2, %v59_v16 }
 0x110   :  { %v98_v19 = vpop.f32.mrf.mxu1 }
 0x111   :  { %v99_v20 = vadd.f32 %v98_v19, %v66_v18 }
 0x113   :  { %v122_v21 = vsel %vm121_vm3, %v99_v20, -inf }
 0x114   :  { %123 = vmax.xlane.f32.xlu0 %v122_v21 }
 0x116   :  { %v118_v23 = vpop.f32.mrf.mxu2 }
 0x117   :  { %v119_v24 = vadd.f32 %v118_v23, %v67_v22 }
 0x119   :  { %147 = vst.msk [vmem:[%s262_s6] sm:$0xff] %vm35_vm0, %v119_v24 }
 0x187   :  { %v124_v25 = vpop.xlane.xlu0 %123 }
 0x188   :  { %v125_v26 = vsub.f32 %v99_v20, %v124_v25 }
 0x18a   :  { %v126_v27 = vmul.f32 1.442695, %v125_v26 }
 0x18c   :  { %162 = vpow2.f32 %v126_v27 }
 0x192   :  { %v163_v28 = vpop.eup %162 }
 0x193   :  { %v128_v29 = vsel %vm121_vm3, %v163_v28, 0.0 }
 0x194   :  { %129 = vadd.xlane.f32.xlu0 %v128_v29 }
 0x207   :  { %v130_v30 = vpop.xlane.xlu0 %129 }
 0x208   :  { %164 = vrcp.f32 %v130_v30  ;;  %v142_v34 = vand.u32 2147483648, %v130_v30  ;;  %v140_v36 = vand.u32 2147483647, %v130_v30  ;;  %vm136_vm5 = vweird.f32 %v130_v30 }
 0x20a   :  { %v143_v38 = vor.u32 1.1754944e-38, %v142_v34  ;;  %vm141_vm7 = vcmp.eq.f32.partialorder %v140_v36, 8.507059e+37 }
 0x20e   :  { %v165_v31 = vpop.eup %164 }
 0x20f   :  { %v132_v32 = vmul.f32 %v165_v31, %v130_v30  ;;  %vm137_vm4 = vweird.f32 %v165_v31 }
 0x210   :  { %vm138_vm6 = vmor %vm136_vm5, %vm137_vm4 }
 0x211   :  { %v133_v33 = vsub.f32 1.0, %v132_v32 }
 0x213   :  { %v134_v35 = vmul.f32 %v165_v31, %v133_v33 }
 0x215   :  { %v135_v37 = vadd.f32 %v165_v31, %v134_v35 }
 0x217   :  { %v139_v39 = vsel %vm138_vm6, %v165_v31, %v135_v37 }
 0x218   :  { %v144_v40 = vsel %vm141_vm7, %v143_v38, %v139_v39 }
 0x219   :  { %v145_v41 = vmul.f32 %v163_v28, %v144_v40 }
 0x21b   :  { %146 = vst.msk [vmem:[%s263_s5] sm:$0xff] %vm121_vm3, %v145_v41 }

</bundles_post_ra>
